<compile_context>
chip_gen: v7x
topology: tpu7x:2x2x1
jax: 0.10.0
libtpu: 0.0.40
codegen_flags: <defaults>
</compile_context>

<pallas_src>
from functools import partial

import jax
import jax.numpy as jnp
import numpy as np
from jax.experimental import pallas as pl
from jax.experimental.pallas import tpu as pltpu

LANE = 128      # lane width (last dim)
SUBLANE = 8     # sublane width (second-to-last dim)


def _round_up(v, m):
    return (v + m - 1) // m * m


def ensemble_kernel(x_ref, w1_ref, w2_ref, out_ref):
    """Single-step fused ensemble forward.

    x_ref  : (B_pad, D_pad)   flattened batch; column D holds 1.0 (b1 carrier),
                              rows/cols beyond that are zero padding
    w1_ref : (D_pad, H_pad)   all members' layer-1 weights packed along N;
                              row D holds b1 per member; one extra column is a
                              constant-1 hidden feature for the b2 carrier
    w2_ref : (H_pad, N_pad)   vstack of layer-2 weights pre-scaled by 1/M;
                              the b2-carrier row holds mean_m(b2_m)
    out_ref: (B_pad, N_pad)   ensemble-mean logits (zero past NUM_CLASSES)
    """
    h = jnp.maximum(
        jnp.dot(x_ref[...], w1_ref[...], preferred_element_type=jnp.float32),
        0.0,
    )
    out_ref[...] = jnp.dot(
        h, w2_ref[...], preferred_element_type=jnp.float32
    ).astype(out_ref.dtype)


def pack_ensemble_params(w1, b1, w2, b2):
    """Fold M members + both biases + the 1/M mean into two lane-dense operands."""
    M, D, Hd = w1.shape
    NC = w2.shape[-1]
    MH = M * Hd                          # packed hidden width over all members
    D_pad = _round_up(D + 1, LANE)       # +1: ones column on x carries b1
    H_pad = _round_up(MH + 1, LANE)      # +1: constant-1 hidden column carries b2
    N_pad = _round_up(NC, LANE)          # lane-dense output slab

    # Layer 1: columns [m*Hd:(m+1)*Hd] = w1[m]; row D = b1[m] (hit by the ones
    # column of x); column MH produces the constant-1 hidden feature.
    w1_cat = jnp.transpose(w1, (1, 0, 2)).reshape(D, MH)         # (D, M*Hd)
    b1_cat = b1[:, 0, :].reshape(MH)                             # (M*Hd,)
    w1p = jnp.zeros((D_pad, H_pad), jnp.float32)
    w1p = w1p.at[:D, :MH].set(w1_cat)
    w1p = w1p.at[D, :MH].set(b1_cat)
    w1p = w1p.at[D, MH].set(1.0)         # relu(1.0) == 1.0 -> b2 carrier feature

    # Layer 2:  (1/M) sum_m (h_m @ w2_m + b2_m)
    #         == h_all @ (vstack_m w2_m / M)  +  mean_m(b2_m)
    w2_stack = w2.reshape(MH, NC)                                # (M*Hd, NC)
    w2p = jnp.zeros((H_pad, N_pad), jnp.float32)
    w2p = w2p.at[:MH, :NC].set(w2_stack / M)
    w2p = w2p.at[MH, :NC].set(jnp.mean(b2[:, 0, :], axis=0))
    return w1p, w2p, D_pad, N_pad


@partial(jax.jit, static_argnames=("D", "NC"))
def _ensemble_apply(x_nchw, w1p, w2p, *, D, NC):
    """Pad x -> fused Pallas kernel -> slice back to (B, NC)."""
    B = x_nchw.shape[0]
    B_pad = _round_up(B, SUBLANE)        # sublane-aligned batch -> unmasked stores
    D_pad = w1p.shape[0]
    N_pad = w2p.shape[1]

    x_flat = x_nchw.reshape(B, D).astype(jnp.float32)
    x_aug = jnp.zeros((B_pad, D_pad), jnp.float32)
    x_aug = x_aug.at[:B, :D].set(x_flat)
    x_aug = x_aug.at[:B, D].set(1.0)     # ones column -> adds b1 before the ReLU

    flops = 2 * B_pad * D_pad * w1p.shape[1] + 2 * B_pad * w1p.shape[1] * N_pad
    bytes_accessed = 4 * (x_aug.size + w1p.size + w2p.size + B_pad * N_pad)

    out_padded = pl.pallas_call(
        ensemble_kernel,
        out_shape=jax.ShapeDtypeStruct((B_pad, N_pad), jnp.float32),
        in_specs=[
            pl.BlockSpec(memory_space=pltpu.MemorySpace.VMEM),
            pl.BlockSpec(memory_space=pltpu.MemorySpace.VMEM),
            pl.BlockSpec(memory_space=pltpu.MemorySpace.VMEM),
        ],
        out_specs=pl.BlockSpec(memory_space=pltpu.MemorySpace.VMEM),
        cost_estimate=pl.CostEstimate(
            flops=flops, transcendentals=0, bytes_accessed=bytes_accessed
        ),
    )(x_aug, w1p, w2p)

    return out_padded[:B, :NC]


def ensemble_forward(x_nchw, w1, b1, w2, b2):
    """x_nchw: (B, C, H, W); w1: (M, D, Hd); b1: (M, 1, Hd);
    w2: (M, Hd, NC); b2: (M, 1, NC).  Returns (B, NC) mean-of-member logits."""
    M, D, Hd = w1.shape
    NC = w2.shape[-1]
    w1p, w2p, _, _ = pack_ensemble_params(w1, b1, w2, b2)
    return _ensemble_apply(x_nchw, w1p, w2p, D=D, NC=NC)


def reference_forward(x_nchw, w1, b1, w2, b2):
    """Pure-JAX reference mirroring the PyTorch ensemble semantics."""
    B = x_nchw.shape[0]
    x_flat = x_nchw.reshape(B, -1).astype(jnp.float32)
    logits = []
    for m in range(w1.shape[0]):
        h = jnp.maximum(x_flat @ w1[m] + b1[m], 0.0)
        logits.append(h @ w2[m] + b2[m])
    # torch.mean(torch.cat([l.unsqueeze(-1) ...], dim=-1), dim=-1)
    return jnp.mean(jnp.stack(logits, axis=-1), axis=-1)


if __name__ == "__main__":
    # Small shapes consistent with "a batch of image tensors"
    B, C_in, H_img, W_img = 2, 4, 16, 16
    D = C_in * H_img * W_img        # 1024 flattened features
    HIDDEN = 32
    NUM_CLASSES = 10
    NUM_MODELS = 3                  # ensemble size (args.ensemble_paths length)

    key = jax.random.PRNGKey(0)
    kx, k1, k2, k3, k4 = jax.random.split(key, 5)

    x = jax.random.normal(kx, (B, C_in, H_img, W_img), dtype=jnp.float32)

    # Deterministic synthetic "snapshot" parameters (stand-ins for torch.load)
    # TODO(synk): real module loads frozen member checkpoints from args.ensemble_paths.
    w1 = 0.02 * jax.random.normal(k1, (NUM_MODELS, D, HIDDEN), dtype=jnp.float32)
    b1 = 0.10 * jax.random.normal(k2, (NUM_MODELS, 1, HIDDEN), dtype=jnp.float32)
    w2 = 0.05 * jax.random.normal(k3, (NUM_MODELS, HIDDEN, NUM_CLASSES), dtype=jnp.float32)
    b2 = 0.10 * jax.random.normal(k4, (NUM_MODELS, 1, NUM_CLASSES), dtype=jnp.float32)

    out = ensemble_forward(x, w1, b1, w2, b2)
    out = jax.block_until_ready(out)

    ref = jax.block_until_ready(reference_forward(x, w1, b1, w2, b2))
    np.testing.assert_allclose(np.asarray(out), np.asarray(ref),
                               rtol=2e-5, atol=2e-5)

    print("KERNEL_OK")
</pallas_src>

<mosaic_0001>
module attributes {stable_mosaic.version = 11 : i64} {
  func.func @ensemble_kernel(%arg0: memref<8x1152xf32, #tpu.memory_space<vmem>>, %arg1: memref<1152x128xf32, #tpu.memory_space<vmem>>, %arg2: memref<128x128xf32, #tpu.memory_space<vmem>>, %arg3: memref<8x128xf32, #tpu.memory_space<vmem>>) attributes {dimension_semantics = [], scalar_prefetch = 0 : i64, scratch_operands = 0 : i64, tpu.core_type = #tpu.core_type<tc>} {
    %c0 = arith.constant 0 : index
    %c0_0 = arith.constant 0 : index
    %0 = vector.load %arg0[%c0, %c0_0] : memref<8x1152xf32, #tpu.memory_space<vmem>>, vector<8x1152xf32>
    %c0_1 = arith.constant 0 : index
    %c0_2 = arith.constant 0 : index
    %1 = vector.load %arg1[%c0_1, %c0_2] : memref<1152x128xf32, #tpu.memory_space<vmem>>, vector<1152x128xf32>
    %cst = arith.constant dense<0.000000e+00> : vector<8x128xf32>
    %2 = tpu.matmul %0, %1, %cst {dimension_numbers = #tpu.dot_dimension_numbers<[1], [0], [0], [1], [0, 0, 1, 1], [], []>} : vector<8x1152xf32>, vector<1152x128xf32>, vector<8x128xf32> -> vector<8x128xf32>
    %cst_3 = arith.constant 0.000000e+00 : f32
    %3 = vector.broadcast %cst_3 : f32 to vector<8x128xf32>
    %4 = arith.maximumf %2, %3 : vector<8x128xf32>
    %c0_4 = arith.constant 0 : index
    %c0_5 = arith.constant 0 : index
    %5 = vector.load %arg2[%c0_4, %c0_5] : memref<128x128xf32, #tpu.memory_space<vmem>>, vector<128x128xf32>
    %cst_6 = arith.constant dense<0.000000e+00> : vector<8x128xf32>
    %6 = tpu.matmul %4, %5, %cst_6 {dimension_numbers = #tpu.dot_dimension_numbers<[1], [0], [0], [1], [0, 0, 1, 1], [], []>} : vector<8x128xf32>, vector<128x128xf32>, vector<8x128xf32> -> vector<8x128xf32>
    %c0_7 = arith.constant 0 : index
    %c0_8 = arith.constant 0 : index
    %7 = vector.load %arg3[%c0_7, %c0_8] : memref<8x128xf32, #tpu.memory_space<vmem>>, vector<8x128xf32>
    tpu.vector_store %arg3[%c0_7, %c0_8], %6 {strides = array<i32>} : memref<8x128xf32, #tpu.memory_space<vmem>>, vector<8x128xf32>,
    return
  }
}

</mosaic_0001>

<bundles_post_ra>
// kernel: _ensemble_apply.1
= control target key start
LH: loop header
LB: loop body
LE: loop exit
PB: predicated region body
PF: predicated region fallthrough
CT: control target
= control target key end

     0   :  { %8 = vsyncpa [#allocation3], 0  ;;  %s1074_s12 = smov [#allocation2]   ;;  %s1206_s0 = inlined_call_operand.vmem [shape: f32[8,1152], index: 0, kind: input, shape index: {}]   ;;  %s1207_s1 = inlined_call_operand.hbm [shape: f32[1152,128], index: 1, kind: input, shape index: {}]   ;;  %s1208_s2 = inlined_call_operand.vmem [shape: f32[128,128], index: 2, kind: input, shape index: {}]   ;;  %s1209_s3 = inlined_call_operand.vmem [shape: f32[8,128], index: 3, kind: output, shape index: {}]  }
   0x1   :  { %s16_s13 = sshll.u32 %s1074_s12, 4  ;;  %s1050_s16 = scalar_lea.hbm %s1207_s1, 18432  ;;  %s17_s13 = int_to_ptr.vmem [resolvable:$true] %s16_s13 }
   0x2   :  { %p1051_p0 = scmp.ne.s32.totalorder %s1207_s1, %s1050_s16  ;;  %p1054_p1 = scmp.lt.u32.totalorder %s1050_s16, %s1207_s1 }
   0x4   :  { %p1056_p2 = pnand %p1054_p1, %p1051_p0 }
   0x6   :  { %1059 = shalt.err (!%p1056_p2)
}
   0x7   :  { %s1060_s21 = scalar_lea.vmem %s17_s13, 18432  ;;  %p1065_p4 = scmp.lt.s32.totalorder %s17_s13, %s17_s13 }
   0x8   :  { %p1061_p3 = scmp.ne.s32.totalorder %s17_s13, %s1060_s21  ;;  %p1066_p5 = scmp.lt.s32.totalorder %s1060_s21, %s1060_s21 }
   0xa   :  { %p1067_p6 = por %p1066_p5, %p1065_p4 }
   0xc   :  { %p1068_p7 = pnand %p1067_p6, %p1061_p3 }
   0xe   :  { %1071 = shalt.err (!%p1068_p7)
}
   0xf   :  { %s1075_s22 = smov 128   ;;  %s1076_s23 = smov 8  }
  0x10   :  { %22 = dma.hbm_to_vmem [thread:$0]  %s1207_s1, 18432, %s17_s13, [#allocation3], %s1075_s22, %s1075_s22, %s1076_s23  }
  0x11   :  { %1072 = dma.done.wait [#allocation3], 18432  }
  0x12   :  { %1073 = vsyncadd [#allocation3], 4294948864  ;;  %v53_v0 = vld [vmem:[#allocation2 + $0x80] sm:$0xff]  ;;  %v54_v1 = vld [vmem:[#allocation2 + $0x88] sm:$0xff]  ;;  %vm1078_vm0 = vmmov 0  }
  0x13   :  { %v85_v2 = vld [vmem:[#allocation2 + $0x180] sm:$0xff]  ;;  %v868_v3 = vpack.c.bf16 %v54_v1, %v53_v0  ;;  %v86_v4 = vld [vmem:[#allocation2 + $0x188] sm:$0xff]  ;;  %v55_v11 = vld [vmem:[#allocation2 + $0x90] sm:$0xff] }
  0x14   :  { %v37_v5 = vld [vmem:[#allocation2] sm:$0xff]  ;;  %v38_v6 = vld [vmem:[#allocation2 + $0x8] sm:$0xff]  ;;  %v900_v7 = vpack.c.bf16 %v86_v4, %v85_v2  ;;  %v56_v13 = vld [vmem:[#allocation2 + $0x98] sm:$0xff] }
  0x15   :  { %v870_v8 = vpack.c.bf16 %v38_v6, %v37_v5  ;;  %v69_v9 = vld [vmem:[#allocation2 + $0x100] sm:$0xff]  ;;  %v70_v10 = vld [vmem:[#allocation2 + $0x108] sm:$0xff]  ;;  %869 = vmatprep.subr.bf16.mxu0 %v868_v3  ;;  %v87_v14 = vld [vmem:[#allocation2 + $0x190] sm:$0xff]  ;;  %v872_v16 = vpack.c.bf16 %v56_v13, %v55_v11 }
  0x16   :  { %v902_v12 = vpack.c.bf16 %v70_v10, %v69_v9  ;;  %v88_v15 = vld [vmem:[#allocation2 + $0x198] sm:$0xff]  ;;  %901 = vmatprep.subr.bf16.mxu1 %v900_v7  ;;  %v39_v18 = vld [vmem:[#allocation2 + $0x10] sm:$0xff]  ;;  %v57_v23 = vld [vmem:[#allocation2 + $0xa0] sm:$0xff] }
  0x17   :  { %871 = vmatpush3.bf16.msra.mxu0 %v870_v8  ;;  %v904_v17 = vpack.c.bf16 %v88_v15, %v87_v14  ;;  %v40_v19 = vld [vmem:[#allocation2 + $0x18] sm:$0xff]  ;;  %v71_v20 = vld [vmem:[#allocation2 + $0x110] sm:$0xff]  ;;  %v58_v24 = vld [vmem:[#allocation2 + $0xa8] sm:$0xff] }
  0x18   :  { %903 = vmatpush3.bf16.msra.mxu1 %v902_v12  ;;  %v874_v21 = vpack.c.bf16 %v40_v19, %v39_v18  ;;  %v72_v22 = vld [vmem:[#allocation2 + $0x118] sm:$0xff]  ;;  %873 = vmatprep.subr.bf16.mxu0 %v872_v16  ;;  %v876_v26 = vpack.c.bf16 %v58_v24, %v57_v23  ;;  %v89_v27 = vld [vmem:[#allocation2 + $0x1a0] sm:$0xff]  ;;  %v90_v28 = vld [vmem:[#allocation2 + $0x1a8] sm:$0xff] }
  0x19   :  { %905 = vmatprep.subr.bf16.mxu1 %v904_v17  ;;  %v906_v25 = vpack.c.bf16 %v72_v22, %v71_v20  ;;  %v41_v29 = vld [vmem:[#allocation2 + $0x20] sm:$0xff]  ;;  %v908_v30 = vpack.c.bf16 %v90_v28, %v89_v27  ;;  %v42_v31 = vld [vmem:[#allocation2 + $0x28] sm:$0xff]  ;;  %v59_v35 = vld [vmem:[#allocation2 + $0xb0] sm:$0xff] }
  0x1a   :  { %v73_v32 = vld [vmem:[#allocation2 + $0x120] sm:$0xff]  ;;  %v74_v33 = vld [vmem:[#allocation2 + $0x128] sm:$0xff]  ;;  %v878_v34 = vpack.c.bf16 %v42_v31, %v41_v29  ;;  %v60_v36 = vld [vmem:[#allocation2 + $0xb8] sm:$0xff] }
  0x1b   :  { %875 = vmatpush3.bf16.msra.mxu0 %v874_v21  ;;  %v91_v37 = vld [vmem:[#allocation2 + $0x1b0] sm:$0xff]  ;;  %v910_v38 = vpack.c.bf16 %v74_v33, %v73_v32  ;;  %v880_v39 = vpack.c.bf16 %v60_v36, %v59_v35  ;;  %v92_v40 = vld [vmem:[#allocation2 + $0x1b8] sm:$0xff]  ;;  %v61_v46 = vld [vmem:[#allocation2 + $0xc0] sm:$0xff] }
  0x1c   :  { %907 = vmatpush3.bf16.msra.mxu1 %v906_v25  ;;  %877 = vmatprep.subr.bf16.mxu0 %v876_v26  ;;  %v43_v41 = vld [vmem:[#allocation2 + $0x30] sm:$0xff]  ;;  %v44_v42 = vld [vmem:[#allocation2 + $0x38] sm:$0xff]  ;;  %v912_v43 = vpack.c.bf16 %v92_v40, %v91_v37  ;;  %v62_v47 = vld [vmem:[#allocation2 + $0xc8] sm:$0xff] }
  0x1d   :  { %909 = vmatprep.subr.bf16.mxu1 %v908_v30  ;;  %v75_v44 = vld [vmem:[#allocation2 + $0x130] sm:$0xff]  ;;  %v76_v45 = vld [vmem:[#allocation2 + $0x138] sm:$0xff]  ;;  %v93_v48 = vld [vmem:[#allocation2 + $0x1c0] sm:$0xff]  ;;  %v882_v50 = vpack.c.bf16 %v44_v42, %v43_v41  ;;  %v884_v52 = vpack.c.bf16 %v62_v47, %v61_v46 }
  0x1e   :  { %v94_v49 = vld [vmem:[#allocation2 + $0x1c8] sm:$0xff]  ;;  %v914_v51 = vpack.c.bf16 %v76_v45, %v75_v44  ;;  %v45_v53 = vld [vmem:[#allocation2 + $0x40] sm:$0xff]  ;;  %v63_v58 = vld [vmem:[#allocation2 + $0xd0] sm:$0xff] }
  0x1f   :  { %879 = vmatpush3.bf16.msra.mxu0 %v878_v34  ;;  %v46_v54 = vld [vmem:[#allocation2 + $0x48] sm:$0xff]  ;;  %v77_v55 = vld [vmem:[#allocation2 + $0x140] sm:$0xff]  ;;  %v916_v56 = vpack.c.bf16 %v94_v49, %v93_v48  ;;  %v64_v59 = vld [vmem:[#allocation2 + $0xd8] sm:$0xff] }
  0x20   :  { %911 = vmatpush3.bf16.msra.mxu1 %v910_v38  ;;  %881 = vmatprep.subr.bf16.mxu0 %v880_v39  ;;  %v78_v57 = vld [vmem:[#allocation2 + $0x148] sm:$0xff]  ;;  %v95_v60 = vld [vmem:[#allocation2 + $0x1d0] sm:$0xff]  ;;  %v96_v61 = vld [vmem:[#allocation2 + $0x1d8] sm:$0xff]  ;;  %v886_v62 = vpack.c.bf16 %v46_v54, %v45_v53  ;;  %v888_v0 = vpack.c.bf16 %v64_v59, %v63_v58 }
  0x21   :  { %913 = vmatprep.subr.bf16.mxu1 %v912_v43  ;;  %v918_v63 = vpack.c.bf16 %v78_v57, %v77_v55  ;;  %v47_v1 = vld [vmem:[#allocation2 + $0x50] sm:$0xff]  ;;  %v48_v2 = vld [vmem:[#allocation2 + $0x58] sm:$0xff]  ;;  %v920_v4 = vpack.c.bf16 %v96_v61, %v95_v60  ;;  %v65_v6 = vld [vmem:[#allocation2 + $0xe0] sm:$0xff] }
  0x22   :  { %v79_v3 = vld [vmem:[#allocation2 + $0x150] sm:$0xff]  ;;  %v80_v5 = vld [vmem:[#allocation2 + $0x158] sm:$0xff]  ;;  %v66_v7 = vld [vmem:[#allocation2 + $0xe8] sm:$0xff]  ;;  %v890_v10 = vpack.c.bf16 %v48_v2, %v47_v1 }
  0x23   :  { %883 = vmatpush3.bf16.msra.mxu0 %v882_v50  ;;  %v97_v8 = vld [vmem:[#allocation2 + $0x1e0] sm:$0xff]  ;;  %v98_v9 = vld [vmem:[#allocation2 + $0x1e8] sm:$0xff]  ;;  %v922_v13 = vpack.c.bf16 %v80_v5, %v79_v3  ;;  %v892_v14 = vpack.c.bf16 %v66_v7, %v65_v6  ;;  %v31_v17 = vld [vmem:[%s1206_s0 + $0x18] sm:$0xff] }
  0x24   :  { %915 = vmatpush3.bf16.msra.mxu1 %v914_v51  ;;  %885 = vmatprep.subr.bf16.mxu0 %v884_v52  ;;  %v49_v11 = vld [vmem:[#allocation2 + $0x60] sm:$0xff]  ;;  %v50_v12 = vld [vmem:[#allocation2 + $0x68] sm:$0xff]  ;;  %v924_v18 = vpack.c.bf16 %v98_v9, %v97_v8  ;;  %v67_v20 = vld [vmem:[#allocation2 + $0xf0] sm:$0xff] }
  0x25   :  { %917 = vmatprep.subr.bf16.mxu1 %v916_v56  ;;  %v81_v15 = vld [vmem:[#allocation2 + $0x160] sm:$0xff]  ;;  %v29_v16 = vld [vmem:[%s1206_s0 + $0x8] sm:$0xff]  ;;  %v68_v21 = vld [vmem:[#allocation2 + $0xf8] sm:$0xff]  ;;  %315 = vmatprep.mubr.f32.mxu1 %v31_v17  ;;  %v894_v24 = vpack.c.bf16 %v50_v12, %v49_v11 }
  0x26   :  { %v82_v19 = vld [vmem:[#allocation2 + $0x168] sm:$0xff]  ;;  %245 = vmatprep.mubr.f32.mxu0 %v29_v16  ;;  %v99_v22 = vld [vmem:[#allocation2 + $0x1f0] sm:$0xff]  ;;  %v100_v23 = vld [vmem:[#allocation2 + $0x1f8] sm:$0xff]  ;;  %v896_v26 = vpack.c.bf16 %v68_v21, %v67_v20 }
  0x27   :  { %887 = vmatpush3.bf16.msra.mxu0 %v886_v62  ;;  %v926_v25 = vpack.c.bf16 %v82_v19, %v81_v15  ;;  %v51_v27 = vld [vmem:[#allocation2 + $0x70] sm:$0xff]  ;;  %v52_v28 = vld [vmem:[#allocation2 + $0x78] sm:$0xff]  ;;  %v928_v30 = vpack.c.bf16 %v100_v23, %v99_v22  ;;  %v117_v32 = vld [vmem:[#allocation2 + $0x280] sm:$0xff] }
  0x28   :  { %919 = vmatpush3.bf16.msra.mxu1 %v918_v63  ;;  %889 = vmatprep.subr.bf16.mxu0 %v888_v0  ;;  %v83_v29 = vld [vmem:[#allocation2 + $0x170] sm:$0xff]  ;;  %v84_v31 = vld [vmem:[#allocation2 + $0x178] sm:$0xff]  ;;  %v118_v33 = vld [vmem:[#allocation2 + $0x288] sm:$0xff]  ;;  %v898_v36 = vpack.c.bf16 %v52_v28, %v51_v27 }
  0x29   :  { %921 = vmatprep.subr.bf16.mxu1 %v920_v4  ;;  %v149_v34 = vld [vmem:[#allocation2 + $0x380] sm:$0xff]  ;;  %v150_v35 = vld [vmem:[#allocation2 + $0x388] sm:$0xff]  ;;  %v930_v37 = vpack.c.bf16 %v84_v31, %v83_v29  ;;  %v932_v38 = vpack.c.bf16 %v118_v33, %v117_v32  ;;  %v119_v44 = vld [vmem:[#allocation2 + $0x290] sm:$0xff] }
  0x2a   :  { %v101_v39 = vld [vmem:[#allocation2 + $0x200] sm:$0xff]  ;;  %v102_v40 = vld [vmem:[#allocation2 + $0x208] sm:$0xff]  ;;  %v964_v42 = vpack.c.bf16 %v150_v35, %v149_v34  ;;  %v120_v45 = vld [vmem:[#allocation2 + $0x298] sm:$0xff] }
  0x2b   :  { %891 = vmatpush3.bf16.msra.mxu0 %v890_v10  ;;  %v133_v41 = vld [vmem:[#allocation2 + $0x300] sm:$0xff]  ;;  %v134_v43 = vld [vmem:[#allocation2 + $0x308] sm:$0xff]  ;;  %v151_v46 = vld [vmem:[#allocation2 + $0x390] sm:$0xff]  ;;  %v934_v50 = vpack.c.bf16 %v102_v40, %v101_v39  ;;  %v936_v52 = vpack.c.bf16 %v120_v45, %v119_v44 }
  0x2c   :  { %923 = vmatpush3.bf16.msra.mxu1 %v922_v13  ;;  %893 = vmatprep.subr.bf16.mxu0 %v892_v14  ;;  %v152_v47 = vld [vmem:[#allocation2 + $0x398] sm:$0xff]  ;;  %v28_v48 = vld [vmem:[%s1206_s0] sm:$0xff]  ;;  %v30_v49 = vld [vmem:[%s1206_s0 + $0x10] sm:$0xff]  ;;  %v966_v51 = vpack.c.bf16 %v134_v43, %v133_v41 }
  0x2d   :  { %925 = vmatprep.subr.bf16.mxu1 %v924_v18  ;;  %v103_v53 = vld [vmem:[#allocation2 + $0x210] sm:$0xff]  ;;  %v104_v54 = vld [vmem:[#allocation2 + $0x218] sm:$0xff]  ;;  %v968_v56 = vpack.c.bf16 %v152_v47, %v151_v46  ;;  %v121_v58 = vld [vmem:[#allocation2 + $0x2a0] sm:$0xff] }
  0x2e   :  { %v135_v55 = vld [vmem:[#allocation2 + $0x310] sm:$0xff]  ;;  %v136_v57 = vld [vmem:[#allocation2 + $0x318] sm:$0xff]  ;;  %v122_v59 = vld [vmem:[#allocation2 + $0x2a8] sm:$0xff]  ;;  %v938_v62 = vpack.c.bf16 %v104_v54, %v103_v53 }
  0x2f   :  { %895 = vmatpush3.bf16.msra.mxu0 %v894_v24  ;;  %v153_v60 = vld [vmem:[#allocation2 + $0x3a0] sm:$0xff]  ;;  %v154_v61 = vld [vmem:[#allocation2 + $0x3a8] sm:$0xff]  ;;  %v970_v63 = vpack.c.bf16 %v136_v57, %v135_v55  ;;  %v940_v0 = vpack.c.bf16 %v122_v59, %v121_v58  ;;  %v123_v6 = vld [vmem:[#allocation2 + $0x2b0] sm:$0xff] }
  0x30   :  { %927 = vmatpush3.bf16.msra.mxu1 %v926_v25  ;;  %897 = vmatprep.subr.bf16.mxu0 %v896_v26  ;;  %v105_v1 = vld [vmem:[#allocation2 + $0x220] sm:$0xff]  ;;  %v106_v2 = vld [vmem:[#allocation2 + $0x228] sm:$0xff]  ;;  %v972_v4 = vpack.c.bf16 %v154_v61, %v153_v60  ;;  %v124_v7 = vld [vmem:[#allocation2 + $0x2b8] sm:$0xff] }
  0x31   :  { %929 = vmatprep.subr.bf16.mxu1 %v928_v30  ;;  %v137_v3 = vld [vmem:[#allocation2 + $0x320] sm:$0xff]  ;;  %v138_v5 = vld [vmem:[#allocation2 + $0x328] sm:$0xff]  ;;  %v155_v8 = vld [vmem:[#allocation2 + $0x3b0] sm:$0xff]  ;;  %v942_v10 = vpack.c.bf16 %v106_v2, %v105_v1  ;;  %v944_v12 = vpack.c.bf16 %v124_v7, %v123_v6 }
  0x32   :  { %v156_v9 = vld [vmem:[#allocation2 + $0x3b8] sm:$0xff]  ;;  %v974_v11 = vpack.c.bf16 %v138_v5, %v137_v3  ;;  %v107_v13 = vld [vmem:[#allocation2 + $0x230] sm:$0xff]  ;;  %v125_v18 = vld [vmem:[#allocation2 + $0x2c0] sm:$0xff] }
  0x33   :  { %899 = vmatpush3.bf16.msra.mxu0 %v898_v36  ;;  %v108_v14 = vld [vmem:[#allocation2 + $0x238] sm:$0xff]  ;;  %v139_v15 = vld [vmem:[#allocation2 + $0x330] sm:$0xff]  ;;  %v976_v16 = vpack.c.bf16 %v156_v9, %v155_v8  ;;  %v126_v19 = vld [vmem:[#allocation2 + $0x2c8] sm:$0xff] }
  0x34   :  { %931 = vmatpush3.bf16.msra.mxu1 %v930_v37  ;;  %933 = vmatprep.subr.bf16.mxu0 %v932_v38  ;;  %v140_v17 = vld [vmem:[#allocation2 + $0x338] sm:$0xff]  ;;  %v157_v20 = vld [vmem:[#allocation2 + $0x3c0] sm:$0xff]  ;;  %v158_v21 = vld [vmem:[#allocation2 + $0x3c8] sm:$0xff]  ;;  %v946_v23 = vpack.c.bf16 %v108_v14, %v107_v13  ;;  %v948_v26 = vpack.c.bf16 %v126_v19, %v125_v18 }
  0x35   :  { %965 = vmatprep.subr.bf16.mxu1 %v964_v42  ;;  %v33_v22 = vld [vmem:[%s1206_s0 + $0x28] sm:$0xff]  ;;  %v35_v24 = vld [vmem:[%s1206_s0 + $0x38] sm:$0xff]  ;;  %v978_v25 = vpack.c.bf16 %v140_v17, %v139_v15  ;;  %v109_v27 = vld [vmem:[#allocation2 + $0x240] sm:$0xff]  ;;  %v980_v30 = vpack.c.bf16 %v158_v21, %v157_v20  ;;  %v1079_v17 = vmov 0.0  }
  0x36   :  { %246 = vmatmul.mubr.f32.vlgmr.msra.gmra.mrb[0].mxu0 %v28_v48  ;;  %v110_v28 = vld [vmem:[#allocation2 + $0x248] sm:$0xff]  ;;  %v141_v29 = vld [vmem:[#allocation2 + $0x340] sm:$0xff]  ;;  %v127_v32 = vld [vmem:[#allocation2 + $0x2d0] sm:$0xff] }
  0x37   :  { %316 = vmatmul.mubr.f32.vlgmr.msra.gmra.mrb[0].mxu1 %v30_v49  ;;  %935 = vmatpush3.bf16.msra.mxu0 %v934_v50  ;;  %v142_v31 = vld [vmem:[#allocation2 + $0x348] sm:$0xff]  ;;  %v128_v33 = vld [vmem:[#allocation2 + $0x2d8] sm:$0xff]  ;;  %v159_v34 = vld [vmem:[#allocation2 + $0x3d0] sm:$0xff]  ;;  %v950_v36 = vpack.c.bf16 %v110_v28, %v109_v27 }
  0x38   :  { %967 = vmatpush3.bf16.msra.mxu1 %v966_v51  ;;  %937 = vmatprep.subr.bf16.mxu0 %v936_v52  ;;  %v160_v35 = vld [vmem:[#allocation2 + $0x3d8] sm:$0xff]  ;;  %v982_v37 = vpack.c.bf16 %v142_v31, %v141_v29  ;;  %v952_v38 = vpack.c.bf16 %v128_v33, %v127_v32  ;;  %v111_v39 = vld [vmem:[#allocation2 + $0x250] sm:$0xff]  ;;  %v129_v44 = vld [vmem:[#allocation2 + $0x2e0] sm:$0xff] }
  0x39   :  { %969 = vmatprep.subr.bf16.mxu1 %v968_v56  ;;  %385 = vmatprep.mubr.f32.mxu0 %v33_v22  ;;  %v112_v40 = vld [vmem:[#allocation2 + $0x258] sm:$0xff]  ;;  %v143_v41 = vld [vmem:[#allocation2 + $0x350] sm:$0xff]  ;;  %v984_v42 = vpack.c.bf16 %v160_v35, %v159_v34  ;;  %v130_v45 = vld [vmem:[#allocation2 + $0x2e8] sm:$0xff] }
  0x3a   :  { %455 = vmatprep.mubr.f32.mxu1 %v35_v24  ;;  %v144_v43 = vld [vmem:[#allocation2 + $0x358] sm:$0xff]  ;;  %v161_v46 = vld [vmem:[#allocation2 + $0x3e0] sm:$0xff]  ;;  %v162_v47 = vld [vmem:[#allocation2 + $0x3e8] sm:$0xff]  ;;  %v954_v48 = vpack.c.bf16 %v112_v40, %v111_v39  ;;  %v956_v50 = vpack.c.bf16 %v130_v45, %v129_v44 }
  0x3b   :  { %939 = vmatpush3.bf16.msra.mxu0 %v938_v62  ;;  %v986_v49 = vpack.c.bf16 %v144_v43, %v143_v41  ;;  %v113_v51 = vld [vmem:[#allocation2 + $0x260] sm:$0xff]  ;;  %v114_v52 = vld [vmem:[#allocation2 + $0x268] sm:$0xff]  ;;  %v988_v54 = vpack.c.bf16 %v162_v47, %v161_v46  ;;  %v131_v56 = vld [vmem:[#allocation2 + $0x2f0] sm:$0xff] }
  0x3c   :  { %971 = vmatpush3.bf16.msra.mxu1 %v970_v63  ;;  %941 = vmatprep.subr.bf16.mxu0 %v940_v0  ;;  %v145_v53 = vld [vmem:[#allocation2 + $0x360] sm:$0xff]  ;;  %v146_v55 = vld [vmem:[#allocation2 + $0x368] sm:$0xff]  ;;  %v132_v57 = vld [vmem:[#allocation2 + $0x2f8] sm:$0xff]  ;;  %v958_v60 = vpack.c.bf16 %v114_v52, %v113_v51 }
  0x3d   :  { %973 = vmatprep.subr.bf16.mxu1 %v972_v4  ;;  %v163_v58 = vld [vmem:[#allocation2 + $0x3f0] sm:$0xff]  ;;  %v164_v59 = vld [vmem:[#allocation2 + $0x3f8] sm:$0xff]  ;;  %v990_v61 = vpack.c.bf16 %v146_v55, %v145_v53  ;;  %v960_v62 = vpack.c.bf16 %v132_v57, %v131_v56  ;;  %v165_v6 = vld [vmem:[#allocation2 + $0x400] sm:$0xff] }
  0x3e   :  { %v115_v63 = vld [vmem:[#allocation2 + $0x270] sm:$0xff]  ;;  %v116_v0 = vld [vmem:[#allocation2 + $0x278] sm:$0xff]  ;;  %v992_v1 = vpack.c.bf16 %v164_v59, %v163_v58  ;;  %v166_v7 = vld [vmem:[#allocation2 + $0x408] sm:$0xff] }
  0x3f   :  { %943 = vmatpush3.bf16.msra.mxu0 %v942_v10  ;;  %v147_v2 = vld [vmem:[#allocation2 + $0x370] sm:$0xff]  ;;  %v148_v3 = vld [vmem:[#allocation2 + $0x378] sm:$0xff]  ;;  %v962_v4 = vpack.c.bf16 %v116_v0, %v115_v63  ;;  %v32_v8 = vld [vmem:[%s1206_s0 + $0x20] sm:$0xff]  ;;  %v997_v9 = vpack.c.bf16 %v166_v7, %v165_v6  ;;  %v1077_v10 = vmov 0.0|0.0  }
  0x40   :  { %975 = vmatpush3.bf16.msra.mxu1 %v974_v11  ;;  %945 = vmatprep.subr.bf16.mxu0 %v944_v12  ;;  %v994_v5 = vpack.c.bf16 %v148_v3, %v147_v2  ;;  %v34_v11 = vld [vmem:[%s1206_s0 + $0x30] sm:$0xff]  ;;  %v168_v13 = vld [vmem:[#allocation2 + $0x418] sm:$0xff]  ;;  %v169_v15 = vld [vmem:[#allocation2 + $0x420] sm:$0xff] }
  0x41   :  { %977 = vmatprep.subr.bf16.mxu1 %v976_v16  ;;  %v167_v12 = vld [vmem:[#allocation2 + $0x410] sm:$0xff]  ;;  %v170_v16 = vld [vmem:[#allocation2 + $0x428] sm:$0xff]  ;;  %v172_v20 = vld [vmem:[#allocation2 + $0x438] sm:$0xff] }
  0x42   :  { %v1000_v14 = vpack.c.bf16 %v168_v13, %v167_v12  ;;  %v1003_v18 = vpack.c.bf16 %v170_v16, %v169_v15  ;;  %v171_v19 = vld [vmem:[#allocation2 + $0x430] sm:$0xff]  ;;  %v173_v22 = vld [vmem:[#allocation2 + $0x440] sm:$0xff]  ;;  %v178_v29 = vld [vmem:[#allocation2 + $0x468] sm:$0xff] }
  0x43   :  { %947 = vmatpush3.bf16.msra.mxu0 %v946_v23  ;;  %v1006_v21 = vpack.c.bf16 %v172_v20, %v171_v19  ;;  %v174_v23 = vld [vmem:[#allocation2 + $0x448] sm:$0xff]  ;;  %v177_v28 = vld [vmem:[#allocation2 + $0x460] sm:$0xff]  ;;  %v179_v31 = vld [vmem:[#allocation2 + $0x470] sm:$0xff] }
  0x44   :  { %979 = vmatpush3.bf16.msra.mxu1 %v978_v25  ;;  %949 = vmatprep.subr.bf16.mxu0 %v948_v26  ;;  %v1009_v24 = vpack.c.bf16 %v174_v23, %v173_v22  ;;  %v175_v25 = vld [vmem:[#allocation2 + $0x450] sm:$0xff]  ;;  %v176_v26 = vld [vmem:[#allocation2 + $0x458] sm:$0xff]  ;;  %v36_v34 = vld [vmem:[%s1206_s0 + $0x40] sm:$0xff] }
  0x45   :  { %981 = vmatprep.subr.bf16.mxu1 %v980_v30  ;;  %v1012_v27 = vpack.c.bf16 %v176_v26, %v175_v25  ;;  %v1015_v30 = vpack.c.bf16 %v178_v29, %v177_v28  ;;  %v180_v32 = vld [vmem:[#allocation2 + $0x478] sm:$0xff]  ;;  %v532_v35 = vld [vmem:[%s1208_s2] sm:$0xff]  ;;  %v538_v44 = vld [vmem:[%s1208_s2 + $0x30] sm:$0xff] }
  0x46   :  { %v1018_v33 = vpack.c.bf16 %v180_v32, %v179_v31  ;;  %v535_v39 = vld [vmem:[%s1208_s2 + $0x18] sm:$0xff]  ;;  %v536_v41 = vld [vmem:[%s1208_s2 + $0x20] sm:$0xff]  ;;  %v546_v56 = vld [vmem:[%s1208_s2 + $0x70] sm:$0xff] }
  0x47   :  { %951 = vmatpush3.bf16.msra.mxu0 %v950_v36  ;;  %v533_v36 = vld [vmem:[%s1208_s2 + $0x8] sm:$0xff]  ;;  %v539_v45 = vld [vmem:[%s1208_s2 + $0x38] sm:$0xff]  ;;  %v540_v47 = vld [vmem:[%s1208_s2 + $0x40] sm:$0xff] }
  0x48   :  { %983 = vmatpush3.bf16.msra.mxu1 %v982_v37  ;;  %953 = vmatprep.subr.bf16.mxu0 %v952_v38  ;;  %v534_v37 = vld [vmem:[%s1208_s2 + $0x10] sm:$0xff]  ;;  %v1021_v38 = vpack.c.bf16 %v533_v36, %v532_v35  ;;  %v1030_v46 = vpack.c.bf16 %v539_v45, %v538_v44  ;;  %v543_v51 = vld [vmem:[%s1208_s2 + $0x58] sm:$0xff]  ;;  %v544_v53 = vld [vmem:[%s1208_s2 + $0x60] sm:$0xff] }
  0x49   :  { %985 = vmatprep.subr.bf16.mxu1 %v984_v42  ;;  %v1024_v40 = vpack.c.bf16 %v535_v39, %v534_v37  ;;  %v537_v42 = vld [vmem:[%s1208_s2 + $0x28] sm:$0xff]  ;;  %v547_v57 = vld [vmem:[%s1208_s2 + $0x78] sm:$0xff] }
  0x4a   :  { %v1027_v43 = vpack.c.bf16 %v537_v42, %v536_v41  ;;  %v1042_v58 = vpack.c.bf16 %v547_v57, %v546_v56 }
  0x4b   :  { %955 = vmatpush3.bf16.msra.mxu0 %v954_v48  ;;  %v541_v48 = vld [vmem:[%s1208_s2 + $0x48] sm:$0xff] }
  0x4c   :  { %987 = vmatpush3.bf16.msra.mxu1 %v986_v49  ;;  %957 = vmatprep.subr.bf16.mxu0 %v956_v50  ;;  %v1033_v49 = vpack.c.bf16 %v541_v48, %v540_v47  ;;  %v542_v50 = vld [vmem:[%s1208_s2 + $0x50] sm:$0xff] }
  0x4d   :  { %989 = vmatprep.subr.bf16.mxu1 %v988_v54  ;;  %v1036_v52 = vpack.c.bf16 %v543_v51, %v542_v50  ;;  %v545_v54 = vld [vmem:[%s1208_s2 + $0x68] sm:$0xff] }
  0x4e   :  { %v1039_v55 = vpack.c.bf16 %v545_v54, %v544_v53 }
  0x4f   :  { %959 = vmatpush3.bf16.msra.mxu0 %v958_v60 }
  0x50   :  { %991 = vmatpush3.bf16.msra.mxu1 %v990_v61  ;;  %961 = vmatprep.subr.bf16.mxu0 %v960_v62 }
  0x51   :  { %993 = vmatprep.subr.bf16.mxu1 %v992_v1 }
  0x53   :  { %963 = vmatpush3.bf16.msra.mxu0 %v962_v4 }
  0x54   :  { %995 = vmatpush3.bf16.msra.mxu1 %v994_v5  ;;  %996 = vmatprep.subr.bf16.mxu0 %v1077_v10 }
  0x55   :  { %1020 = vmatprep.subr.bf16.mxu1 %v1077_v10 }
  0x56   :  { %386 = vmatmul.mubr.f32.vlgmr.msra.gmra.mrb[2].mxu0 %v32_v8 }
  0x57   :  { %998 = vmatpush3.bf16.msra.mxu0 %v997_v9  ;;  %456 = vmatmul.mubr.f32.vlgmr.msra.gmra.mrb[2].mxu1 %v34_v11 }
  0x58   :  { %999 = vmatprep.subr.bf16.mxu0 %v1077_v10  ;;  %830 = vmatprep.mubr.msk.f32.mxu0 %vm1078_vm0, %v1079_v17 }
  0x59   :  { %865 = vmatprep.mubr.msk.f32.mxu1 %vm1078_vm0, %v1079_v17  ;;  %1022 = vmatpush3.bf16.msra.mxu1 %v1021_v38 }
  0x5a   :  { %1023 = vmatprep.subr.bf16.mxu1 %v1077_v10 }
  0x5b   :  { %1001 = vmatpush3.bf16.msra.mxu0 %v1000_v14 }
  0x5c   :  { %1002 = vmatprep.subr.bf16.mxu0 %v1077_v10 }
  0x5d   :  { %1025 = vmatpush3.bf16.msra.mxu1 %v1024_v40 }
  0x5e   :  { %1026 = vmatprep.subr.bf16.mxu1 %v1077_v10 }
  0x5f   :  { %1004 = vmatpush3.bf16.msra.mxu0 %v1003_v18 }
  0x60   :  { %1005 = vmatprep.subr.bf16.mxu0 %v1077_v10 }
  0x61   :  { %1028 = vmatpush3.bf16.msra.mxu1 %v1027_v43 }
  0x62   :  { %1029 = vmatprep.subr.bf16.mxu1 %v1077_v10 }
  0x63   :  { %1007 = vmatpush3.bf16.msra.mxu0 %v1006_v21 }
  0x64   :  { %1008 = vmatprep.subr.bf16.mxu0 %v1077_v10 }
  0x65   :  { %1031 = vmatpush3.bf16.msra.mxu1 %v1030_v46 }
  0x66   :  { %1032 = vmatprep.subr.bf16.mxu1 %v1077_v10 }
  0x67   :  { %1010 = vmatpush3.bf16.msra.mxu0 %v1009_v24 }
  0x68   :  { %1011 = vmatprep.subr.bf16.mxu0 %v1077_v10 }
  0x69   :  { %1034 = vmatpush3.bf16.msra.mxu1 %v1033_v49 }
  0x6a   :  { %1035 = vmatprep.subr.bf16.mxu1 %v1077_v10 }
  0x6b   :  { %1013 = vmatpush3.bf16.msra.mxu0 %v1012_v27 }
  0x6c   :  { %1014 = vmatprep.subr.bf16.mxu0 %v1077_v10 }
  0x6d   :  { %1037 = vmatpush3.bf16.msra.mxu1 %v1036_v52 }
  0x6e   :  { %1038 = vmatprep.subr.bf16.mxu1 %v1077_v10 }
  0x6f   :  { %1016 = vmatpush3.bf16.msra.mxu0 %v1015_v30 }
  0x70   :  { %1017 = vmatprep.subr.bf16.mxu0 %v1077_v10 }
  0x71   :  { %1040 = vmatpush3.bf16.msra.mxu1 %v1039_v55 }
  0x72   :  { %1041 = vmatprep.subr.bf16.mxu1 %v1077_v10 }
  0x73   :  { %1019 = vmatpush3.bf16.msra.mxu0 %v1018_v33 }
  0x75   :  { %1043 = vmatpush3.bf16.msra.mxu1 %v1042_v58 }
  0x76   :  { %831 = vmatmul.mubr.f32.vlgmr.msra.gmra.mrb[4].mxu0 %v36_v34 }
 0x109   :  { %v656_v59 = vpop.f32.mrb[0].mxu0 }
 0x10a   :  { %v691_v60 = vpop.f32.mrb[0].mxu1  ;;  %v657_v61 = vpop.f32.mrb[1].mxu0 }
 0x10b   :  { %v658_v62 = vadd.f32 %v657_v61, %v656_v59  ;;  %v692_v63 = vpop.f32.mrb[1].mxu1 }
 0x10c   :  { %v693_v0 = vadd.f32 %v692_v63, %v691_v60 }
 0x10e   :  { %v318_v1 = vadd.f32 %v693_v0, %v658_v62 }
 0x129   :  { %v726_v2 = vpop.f32.mrb[2].mxu0 }
 0x12a   :  { %v727_v3 = vpop.f32.mrb[3].mxu0  ;;  %v761_v4 = vpop.f32.mrb[2].mxu1 }
 0x12b   :  { %v728_v5 = vadd.f32 %v727_v3, %v726_v2  ;;  %v762_v6 = vpop.f32.mrb[3].mxu1 }
 0x12c   :  { %v763_v7 = vadd.f32 %v762_v6, %v761_v4 }
 0x12d   :  { %v388_v8 = vadd.f32 %v728_v5, %v318_v1 }
 0x12f   :  { %v458_v9 = vadd.f32 %v763_v7, %v388_v8 }
 0x149   :  { %v527_v10 = vpop.f32.mrb[4].mxu0 }
 0x14a   :  { %v528_v11 = vadd.f32 %v527_v10, %v458_v9  ;;  %v832_v12 = vpop.f32.mrb[5].mxu0 }
 0x14c   :  { %v531_v13 = vmax.f32 %v528_v11, 0.0 }
 0x14e   :  { %866 = vmatmul.mubr.f32.vlgmr.msra.gmra.mrb[4].mxu1 %v531_v13 }
 0x221   :  { %v614_v14 = vpop.f32.mrb[4].mxu1 }
 0x222   :  { %618 = vst [vmem:[%s1209_s3] sm:$0xff] %v614_v14  ;;  %v867_v15 = vpop.f32.mrb[5].mxu1 }
 0x223   :  { %623 = vsyncpa [#allocation3], 1 }

</bundles_post_ra>
